<compile_context>
chip_gen: v5e
topology: v5e:2x2
jax: 0.10.0
libtpu: 0.0.40
codegen_flags: <defaults>
</compile_context>

<pallas_src>
import jax
import jax.numpy as jnp
from jax.experimental import pallas as pl
from jax.experimental.pallas import tpu as pltpu


def _meta_learner_kernel(x_ref, w_ref, b_ref, o_ref):
    # x: (TB, F_in), w: (F_in, F_out)  [pre-transposed -> native MXU [K, N]],
    # b: (1, F_out) f32, o: (TB, F_out)
    z = jnp.dot(x_ref[...], w_ref[...], preferred_element_type=jnp.float32)
    z = z + b_ref[...]                                   # f32 bias, broadcast over rows
    o_ref[...] = jax.nn.sigmoid(z).astype(o_ref.dtype)   # f32 epilogue (v5e-safe)


def _tpu_generation():
    """Best-effort chip-generation detection: 'v5e' / 'v6e' / 'v7x' / 'other'."""
    try:
        kind = jax.devices()[0].device_kind.lower()
    except Exception:
        return "other"
    if "7" in kind:
        return "v7x"
    if "v6" in kind:
        return "v6e"
    if "v5" in kind:
        return "v5e"
    return "other"


def _round_down8(n):
    return max(8, (n // 8) * 8)


def _pick_tile_b(B, F_in, F_out, x_itemsize, out_itemsize, gen):
    """Pick a batch tile: ~4 MiB of HBM traffic per grid step (amortizes the
    ~0.35us fixed step cost), bounded by a per-generation VMEM budget for the
    double-buffered x/out blocks.  Only v7x (2 TCs) gets a forced multi-step
    'parallel' split; single-TC v5e/v6e keep as few steps as possible."""
    row_bytes = F_in * x_itemsize + F_out * out_itemsize          # HBM bytes per row
    target_rows = max(8, (4 * 1024 * 1024) // row_bytes)          # ~4 MiB per step

    if gen == "v7x":
        vmem_budget = 20 * 1024 * 1024      # of 64 MiB physical VMEM
    elif gen in ("v5e", "v6e"):
        vmem_budget = 48 * 1024 * 1024      # of 128 MiB physical VMEM
    else:
        vmem_budget = 8 * 1024 * 1024       # conservative for unknown chips
    vmem_rows = max(8, vmem_budget // (2 * row_bytes))            # double-buffered

    tile = min(B, target_rows, vmem_rows)

    if tile >= B:
        # One step covers everything.  On v7x split into 2 balanced halves,
        # but only when each half still moves >= ~1 MiB (otherwise the extra
        # per-step overhead outweighs the 2-TC parallelism).
        if gen == "v7x" and B >= 16 and B * row_bytes >= 2 * 1024 * 1024:
            half = ((pl.cdiv(B, 2) + 7) // 8) * 8     # cdiv(B,2), sublane-aligned up
            if pl.cdiv(B, half) == 2:
                return half
        return B

    tile = _round_down8(tile)
    if gen == "v7x":
        # Prefer an even number of grid steps so both TensorCores stay busy
        # on the final pair of steps.
        nsteps = pl.cdiv(B, tile)
        if nsteps % 2:
            t = ((pl.cdiv(B, nsteps + 1) + 7) // 8) * 8
            if t >= 8 and pl.cdiv(B, t) % 2 == 0:
                tile = t
    return tile


def prepare_meta_learner_params(weight, bias):
    """One-time parameter preparation (hoist out of the per-call path).

    weight: [F_out, F_in] (PyTorch nn.Linear layout) -> [F_in, F_out] so the
    MXU gets its native [K, N] orientation (no per-step transpose);
    bias -> f32 [1, F_out]."""
    w_t = jnp.asarray(weight).T
    b2 = jnp.asarray(bias).astype(jnp.float32).reshape(1, -1)
    return w_t, b2


def meta_learner_apply(x, w_t, b2, *, tile_b=None):
    """x: [B, F_in]; w_t: [F_in, F_out]; b2: [1, F_out] f32 (prepared params)."""
    B, F_in = x.shape
    F_out = w_t.shape[1]
    out_dtype = x.dtype

    x_itemsize = jnp.dtype(x.dtype).itemsize
    w_itemsize = jnp.dtype(w_t.dtype).itemsize
    out_itemsize = jnp.dtype(out_dtype).itemsize
    gen = _tpu_generation()

    if tile_b is None:
        tile_b = _pick_tile_b(B, F_in, F_out, x_itemsize, out_itemsize, gen)
    tile_b = int(min(tile_b, B))
    grid = (pl.cdiv(B, tile_b),)

    cost = pl.CostEstimate(
        flops=2 * B * F_in * F_out,
        transcendentals=B * F_out,
        bytes_accessed=(B * F_in * x_itemsize
                        + F_in * F_out * w_itemsize
                        + F_out * 4
                        + B * F_out * out_itemsize),
    )

    # Exact double-buffered block footprint + resident params + headroom.
    # Only override the scoped-VMEM default when the blocks actually need it;
    # cap per generation (v7x has only 64 MiB physical VMEM).
    block_bytes = 2 * tile_b * (F_in * x_itemsize + F_out * out_itemsize)
    param_bytes = F_in * F_out * w_itemsize + F_out * 4
    vmem_needed = block_bytes + param_bytes + (2 << 20)
    vmem_limit = None
    if vmem_needed > (16 << 20):
        cap = (48 << 20) if gen == "v7x" else (96 << 20)
        vmem_limit = int(min(vmem_needed, cap))

    return pl.pallas_call(
        _meta_learner_kernel,
        out_shape=jax.ShapeDtypeStruct((B, F_out), out_dtype),
        grid_spec=pltpu.PrefetchScalarGridSpec(
            num_scalar_prefetch=0,
            grid=grid,
            in_specs=[
                pl.BlockSpec((tile_b, F_in), lambda i: (i, 0)),
                pl.BlockSpec((F_in, F_out), lambda i: (0, 0)),   # weight resident
                pl.BlockSpec((1, F_out), lambda i: (0, 0)),      # bias resident
            ],
            out_specs=pl.BlockSpec((tile_b, F_out), lambda i: (i, 0)),
        ),
        compiler_params=pltpu.CompilerParams(
            dimension_semantics=("parallel",),   # batch tiles shard across v7x TCs
            vmem_limit_bytes=vmem_limit,
        ),
        cost_estimate=cost,
    )(x, w_t, b2)


def meta_learner_forward(x, weight, bias, *, tile_b=None):
    """Convenience wrapper taking PyTorch-layout params.  For repeated calls,
    prepare params once with prepare_meta_learner_params and use
    meta_learner_apply directly (avoids per-call transpose/cast ops)."""
    w_t, b2 = prepare_meta_learner_params(weight, bias)
    return meta_learner_apply(x, w_t, b2, tile_b=tile_b)


if __name__ == "__main__":
    def make_inputs(key, B, F_in, F_out):
        kx, kw, kb = jax.random.split(key, 3)
        x = jax.random.normal(kx, (B, F_in), dtype=jnp.float32)
        # Deterministic init mimicking nn.Linear's uniform(-1/sqrt(F_in), 1/sqrt(F_in)).
        bound = 1.0 / jnp.sqrt(jnp.float32(F_in))
        w = jax.random.uniform(kw, (F_out, F_in), minval=-bound, maxval=bound,
                               dtype=jnp.float32)
        b = jax.random.uniform(kb, (F_out,), minval=-bound, maxval=bound,
                               dtype=jnp.float32)
        return x, w, b

    # Small shapes implied by the module: batch=8, in_features=32, out_features=16.
    # Uses the prepared-parameter path (transpose/cast hoisted out of the call).
    x, w, b = make_inputs(jax.random.PRNGKey(0), 8, 32, 16)
    w_t, b2 = prepare_meta_learner_params(w, b)
    out = jax.block_until_ready(meta_learner_apply(x, w_t, b2))
    ref = jax.nn.sigmoid(x @ w.T + b)
    assert out.shape == (8, 16)
    assert jnp.allclose(out, ref, atol=1e-5, rtol=1e-5)

    # Multi-step grid with a ragged tail block (explicit tile override).
    x, w, b = make_inputs(jax.random.PRNGKey(1), 200, 32, 16)
    out = jax.block_until_ready(meta_learner_forward(x, w, b, tile_b=96))
    ref = jax.nn.sigmoid(x @ w.T + b)
    assert out.shape == (200, 16)
    assert jnp.allclose(out, ref, atol=1e-5, rtol=1e-5)

    # Larger batch exercising the auto-picked, generation-aware tile.
    x, w, b = make_inputs(jax.random.PRNGKey(2), 4096, 32, 16)
    out = jax.block_until_ready(meta_learner_forward(x, w, b))
    ref = jax.nn.sigmoid(x @ w.T + b)
    assert out.shape == (4096, 16)
    assert jnp.allclose(out, ref, atol=1e-5, rtol=1e-5)

    print("KERNEL_OK")
</pallas_src>

<mosaic_0001>
module attributes {stable_mosaic.version = 11 : i64} {
  func.func @_meta_learner_kernel(%arg0: i32, %arg1: memref<8x32xf32, #tpu.memory_space<vmem>>, %arg2: memref<32x16xf32, #tpu.memory_space<vmem>>, %arg3: memref<1x16xf32, #tpu.memory_space<vmem>>, %arg4: memref<8x16xf32, #tpu.memory_space<vmem>>) attributes {dimension_semantics = [#tpu.dimension_semantics<parallel>], iteration_bounds = array<i64: 1>, scalar_prefetch = 0 : i64, scratch_operands = 0 : i64, tpu.core_type = #tpu.core_type<tc>, window_params = [{transform_indices = @transform_0, window_bounds = array<i64: 8, 32>}, {pipeline_mode = #tpu.pipeline_mode<synchronous>, transform_indices = @transform_1, window_bounds = array<i64: 32, 16>}, {pipeline_mode = #tpu.pipeline_mode<synchronous>, transform_indices = @transform_2, window_bounds = array<i64: 1, 16>}, {transform_indices = @transform_3, window_bounds = array<i64: 8, 16>}]} {
    %c0 = arith.constant 0 : index
    %c0_0 = arith.constant 0 : index
    %0 = vector.load %arg1[%c0, %c0_0] : memref<8x32xf32, #tpu.memory_space<vmem>>, vector<8x32xf32>
    %c0_1 = arith.constant 0 : index
    %c0_2 = arith.constant 0 : index
    %1 = vector.load %arg2[%c0_1, %c0_2] : memref<32x16xf32, #tpu.memory_space<vmem>>, vector<32x16xf32>
    %cst = arith.constant dense<0.000000e+00> : vector<8x16xf32>
    %2 = tpu.matmul %0, %1, %cst {dimension_numbers = #tpu.dot_dimension_numbers<[1], [0], [0], [1], [0, 0, 1, 1], [], []>} : vector<8x32xf32>, vector<32x16xf32>, vector<8x16xf32> -> vector<8x16xf32>
    %c0_3 = arith.constant 0 : index
    %c0_4 = arith.constant 0 : index
    %3 = vector.load %arg3[%c0_3, %c0_4] : memref<1x16xf32, #tpu.memory_space<vmem>>, vector<1x16xf32>
    %4 = vector.broadcast %3 : vector<1x16xf32> to vector<8x16xf32>
    %5 = arith.addf %2, %4 : vector<8x16xf32>
    %6 = arith.negf %5 : vector<8x16xf32>
    %7 = math.exp %6 : vector<8x16xf32>
    %cst_5 = arith.constant 1.000000e+00 : f32
    %8 = vector.broadcast %cst_5 : f32 to vector<8x16xf32>
    %9 = arith.addf %8, %7 : vector<8x16xf32>
    %10 = arith.divf %8, %9 : vector<8x16xf32>
    %c0_6 = arith.constant 0 : index
    %c0_7 = arith.constant 0 : index
    %11 = vector.load %arg4[%c0_6, %c0_7] : memref<8x16xf32, #tpu.memory_space<vmem>>, vector<8x16xf32>
    tpu.vector_store %arg4[%c0_6, %c0_7], %10 {strides = array<i32>} : memref<8x16xf32, #tpu.memory_space<vmem>>, vector<8x16xf32>,
    return
  }
  func.func @transform_0(%arg0: i32) -> (i32, i32) {
    %c0_i32 = arith.constant 0 : i32
    %c0_i32_0 = arith.constant 0 : i32
    return %arg0, %c0_i32 : i32, i32
  }
  func.func @transform_1(%arg0: i32) -> (i32, i32) {
    %c0_i32 = arith.constant 0 : i32
    %c0_i32_0 = arith.constant 0 : i32
    %c0_i32_1 = arith.constant 0 : i32
    return %c0_i32, %c0_i32_0 : i32, i32
  }
  func.func @transform_2(%arg0: i32) -> (i32, i32) {
    %c0_i32 = arith.constant 0 : i32
    %c0_i32_0 = arith.constant 0 : i32
    %c0_i32_1 = arith.constant 0 : i32
    return %c0_i32, %c0_i32_0 : i32, i32
  }
  func.func @transform_3(%arg0: i32) -> (i32, i32) {
    %c0_i32 = arith.constant 0 : i32
    %c0_i32_0 = arith.constant 0 : i32
    return %arg0, %c0_i32 : i32, i32
  }
}

</mosaic_0001>

<bundles_post_ra>
// kernel: tpu_custom_call.1
= control target key start
LH: loop header
LB: loop body
LE: loop exit
PB: predicated region body
PF: predicated region fallthrough
CT: control target
= control target key end

     0   :  { %s161_s0 = inlined_call_operand.vmem [shape: f32[8,32], index: 0, kind: input, shape index: {}]   ;;  %s162_s1 = inlined_call_operand.vmem [shape: f32[32,16], index: 1, kind: input, shape index: {}]   ;;  %s163_s2 = inlined_call_operand.vmem [shape: f32[1,16], index: 2, kind: input, shape index: {}]   ;;  %s164_s3 = inlined_call_operand.hbm [shape: f32[8,16], index: 3, kind: output, shape index: {}]  }
   0x1   :  { %v19_v0 = vld [vmem:[%s162_s1 + $0x18] sm:$0xff]  ;;  %v18_v1 = vld [vmem:[%s162_s1 + $0x10] sm:$0xff]  ;;  %v17_v2 = vld [vmem:[%s162_s1 + $0x8] sm:$0xff] }
   0x2   :  { %40 = vmatpush.msra.mxu0 %v19_v0 }
   0x3   :  { %8 = vsyncpa [#allocation3], 0  ;;  %v16_v3 = vld [vmem:[%s162_s1] sm:$0xff]  ;;  %vm24_vm0 = vcmask 261120   ;;  %vm67_vm4 = vcmask 130048  }
   0x4   :  { %41 = vmatpush.msra.mxu0 %v18_v1  ;;  %v15_v4 = vld [vmem:[%s161_s0] sm:$0xff]  ;;  %s119_s0 = smov [#allocation2]  }
   0x5   :  { %v88_v5 = vld [vmem:[%s163_s2] ss:$0 sm:$0xff]  ;;  %s74_s1 = sshll.u32 %s119_s0, 4  ;;  %s76_s2 = sshll.u32 %s164_s3, 4  ;;  %s75_s1 = int_to_ptr.vmem [resolvable:$true] %s74_s1  ;;  %s77_s2 = int_to_ptr.hbm [resolvable:$true] %s76_s2 }
   0x6   :  { %42 = vmatpush.msra.mxu0 %v17_v2 }
   0x8   :  { %43 = vmatpush.msra.mxu0 %v16_v3 }
   0x9   :  { %85 = vmatmul.msk.f32.vlgmr.msra.gmra.mxu0 %vm24_vm0, %v15_v4 }
  0x86   :  { %v45_v6 = vpop.f32.mrf.mxu0 }
  0x87   :  { %v46_v7 = vadd.f32 %v88_v5, %v45_v6 }
  0x89   :  { %v86_v8 = vmul.f32 -1.442695, %v46_v7 }
  0x8b   :  { %89 = vpow2.f32 %v86_v8 }
  0x91   :  { %v90_v9 = vpop.eup %89 }
  0x92   :  { %v51_v10 = vadd.f32 1.0, %v90_v9 }
  0x94   :  { %91 = vrcp.f32 %v51_v10  ;;  %v63_v14 = vand.u32 2147483648, %v51_v10  ;;  %v61_v16 = vand.u32 2147483647, %v51_v10  ;;  %vm57_vm2 = vweird.f32 %v51_v10 }
  0x96   :  { %v64_v18 = vor.u32 1.1754944e-38, %v63_v14  ;;  %vm62_vm5 = vcmp.eq.f32.partialorder %v61_v16, 8.507059e+37 }
  0x9a   :  { %v92_v11 = vpop.eup %91 }
  0x9b   :  { %v53_v12 = vmul.f32 %v92_v11, %v51_v10  ;;  %vm58_vm1 = vweird.f32 %v92_v11 }
  0x9c   :  { %vm59_vm3 = vmor %vm57_vm2, %vm58_vm1 }
  0x9d   :  { %v54_v13 = vsub.f32 1.0, %v53_v12 }
  0x9f   :  { %v55_v15 = vmul.f32 %v92_v11, %v54_v13 }
  0xa1   :  { %v56_v17 = vadd.f32 %v92_v11, %v55_v15 }
  0xa3   :  { %v60_v19 = vsel %vm59_vm3, %v92_v11, %v56_v17 }
  0xa4   :  { %v65_v20 = vsel %vm62_vm5, %v64_v18, %v60_v19 }
  0xa5   :  { %68 = vst.msk [vmem:[#allocation2] sm:$0xff] %vm67_vm4, %v65_v20 }
  0xa6   :  { %79 = dma.vmem_to_hbm [thread:$0]  %s75_s1, 128, %s77_s2, [#allocation3]  }
  0xa7   :  { %117 = dma.done.wait [#allocation3], 128  }
  0xa8   :  { %118 = vsyncadd [#allocation3], 4294967168 }
  0xa9   :  { %84 = vsyncpa [#allocation3], 1 }

</bundles_post_ra>
